<compile_context>
chip_gen: v5e
topology: v5e:2x2
jax: 0.10.0
libtpu: 0.0.40
codegen_flags: <defaults>
</compile_context>

<pallas_src>
import jax
import jax.numpy as jnp
from jax.experimental import pallas as pl
from jax.experimental.pallas import tpu as pltpu


def make_recurrent_kernel(seq, bp, input_size, hidden, output, layers):
    """Builds the fused wavefront RNN + decoder kernel (statically unrolled)."""
    LH = layers * hidden
    n_wave = seq + layers - 1
    top_lo = (layers - 1) * hidden

    def kernel(x_ref, w_in_ref, b_cat_ref, w_cat_ref, w_dec_ref, b_dec_ref,
               out_ref):
        # ---- hoisted input projection for every timestep, biases folded.
        # w_in is (input, L*H) with zeros outside layer-0's lanes, so the
        # per-step add below is one full-lane VPU add.
        proj = jnp.dot(x_ref[...].astype(jnp.bfloat16), w_in_ref[...],
                       preferred_element_type=jnp.float32) + b_cat_ref[...]
        w_cat = w_cat_ref[...]                       # (L*H, L*H) bf16

        if layers > 1:
            # hoisted lane index for the warm-up masking (not re-built per step)
            lane = jax.lax.broadcasted_iota(jnp.int32, (bp, LH), 1)

        # fused wavefront state: lanes [l*H:(l+1)*H] hold h_l(t - l)
        state = jnp.zeros((bp, LH), jnp.float32)
        for s in range(n_wave):
            t = min(s, seq - 1)   # t >= seq entries only feed dead slots
            pre = proj[t * bp:(t + 1) * bp, :] + jnp.dot(
                state.astype(jnp.bfloat16), w_cat,
                preferred_element_type=jnp.float32)
            state = jnp.tanh(pre)
            if s < layers - 1:
                # warm-up: layers l > s keep their zero initial hidden
                state = jnp.where(lane < (s + 1) * hidden, state, 0.0)

        # ---- decoder on the last time step of the top layer ----
        h_top = state[:, top_lo:]
        out_ref[...] = (jnp.dot(h_top.astype(jnp.bfloat16), w_dec_ref[...],
                                preferred_element_type=jnp.float32)
                        + b_dec_ref[...])

    return kernel


def recurrent_forward(x, params, *, layers):
    """x: (seq, batch, input_size) float32.  Returns (batch, output)."""
    seq, batch, input_size = x.shape
    w_ih0_t, w_ihr_t, w_hh_t, b_ih, b_hh, w_dec_t, b_dec = params
    hidden = w_ih0_t.shape[1]
    output = w_dec_t.shape[1]
    LH = layers * hidden

    # Sublane-pad batch so every per-wave row slice is (8, .)-tile aligned.
    bp = max(8, ((batch + 7) // 8) * 8)
    x_pad = jnp.zeros((seq, bp, input_size), jnp.float32).at[:, :batch, :].set(x)
    x_flat = x_pad.reshape(seq * bp, input_size)

    # Block-upper-triangular fused recurrence matrix:
    #   W_cat[l, l]   = W_hh_l   (same-layer recurrence)
    #   W_cat[l-1, l] = W_ih_l   (layer l's input from layer l-1, one wave behind)
    w_cat = jnp.zeros((LH, LH), jnp.float32)
    for l in range(layers):
        w_cat = w_cat.at[l * hidden:(l + 1) * hidden,
                         l * hidden:(l + 1) * hidden].set(w_hh_t[l])
    for l in range(1, layers):
        w_cat = w_cat.at[(l - 1) * hidden:l * hidden,
                         l * hidden:(l + 1) * hidden].set(w_ihr_t[l - 1])

    # Layer-0 input weights, zero-padded to L*H output lanes.
    w_in_pad = jnp.zeros((input_size, LH), jnp.float32).at[:, :hidden].set(w_ih0_t)
    # Pre-summed (b_ih + b_hh) for every layer, layer-major along lanes.
    bias_cat = (b_ih + b_hh).reshape(1, LH)

    kernel = make_recurrent_kernel(seq, bp, input_size, hidden, output, layers)

    out = pl.pallas_call(
        kernel,
        out_shape=jax.ShapeDtypeStruct((bp, output), jnp.float32),
        in_specs=[pl.BlockSpec(memory_space=pltpu.MemorySpace.VMEM)] * 6,
        out_specs=pl.BlockSpec(memory_space=pltpu.MemorySpace.VMEM),
    )(x_flat,
      w_in_pad.astype(jnp.bfloat16),
      bias_cat,
      w_cat.astype(jnp.bfloat16),
      w_dec_t.astype(jnp.bfloat16),
      b_dec)
    return out[:batch]


def init_params(key, input_size, hidden, output, layers):
    """Deterministic parameter init, PyTorch-style U(-1/sqrt(hidden), 1/sqrt(hidden))."""
    k = 1.0 / jnp.sqrt(jnp.float32(hidden))
    keys = jax.random.split(key, 7)
    u = lambda kk, shape: jax.random.uniform(kk, shape, jnp.float32, -k, k)

    # Pre-transposed weights (in_dim, out_dim) so the kernel does x @ W.
    w_ih0_t = u(keys[0], (input_size, hidden))
    n_rest = max(layers - 1, 1)   # dummy slot when layers == 1 (never read)
    w_ihr_t = u(keys[1], (n_rest, hidden, hidden))
    w_hh_t = u(keys[2], (layers, hidden, hidden))
    b_ih = u(keys[3], (layers, 1, hidden))
    b_hh = u(keys[4], (layers, 1, hidden))
    w_dec_t = u(keys[5], (hidden, output))
    b_dec = u(keys[6], (1, output))
    return (w_ih0_t, w_ihr_t, w_hh_t, b_ih, b_hh, w_dec_t, b_dec)


def reference_forward(x, params, *, layers):
    """Pure-JAX f32 reference mirroring torch.nn.RNN(tanh) + Linear on output[-1]."""
    w_ih0_t, w_ihr_t, w_hh_t, b_ih, b_hh, w_dec_t, b_dec = params
    seq, batch, _ = x.shape
    hidden = w_ih0_t.shape[1]
    layer_in = x
    for l in range(layers):
        w_in = w_ih0_t if l == 0 else w_ihr_t[l - 1]
        h = jnp.zeros((batch, hidden), jnp.float32)
        outs = []
        for t in range(seq):
            h = jnp.tanh(layer_in[t] @ w_in + b_ih[l] + h @ w_hh_t[l] + b_hh[l])
            outs.append(h)
        layer_in = jnp.stack(outs, axis=0)
    return layer_in[-1] @ w_dec_t + b_dec


if __name__ == "__main__":
    # Small shapes consistent with the module's forward:
    seq, batch = 8, 2
    input_size, hidden, output, layers = 16, 32, 8, 2

    key = jax.random.PRNGKey(0)
    kx, kp = jax.random.split(key)
    x = jax.random.normal(kx, (seq, batch, input_size), jnp.float32)
    params = init_params(kp, input_size, hidden, output, layers)

    y = recurrent_forward(x, params, layers=layers)
    y = jax.block_until_ready(y)

    y_ref = reference_forward(x, params, layers=layers)
    assert y.shape == (batch, output)
    # bf16 MXU operands (f32 accumulation) -> relaxed tolerance vs f32 reference.
    assert jnp.allclose(y, y_ref, atol=5e-2, rtol=5e-2), "mismatch vs JAX reference"

    # Also exercise the layers == 1 path (plain recurrence, no warm-up masking).
    p1 = init_params(kp, input_size, hidden, output, 1)
    y1 = jax.block_until_ready(recurrent_forward(x, p1, layers=1))
    assert jnp.allclose(y1, reference_forward(x, p1, layers=1), atol=5e-2, rtol=5e-2)

    print("KERNEL_OK")
</pallas_src>

<mosaic_0001>
module attributes {stable_mosaic.version = 11 : i64} {
  func.func @kernel(%arg0: memref<64x16xf32, #tpu.memory_space<vmem>>, %arg1: memref<16x64xbf16, #tpu.memory_space<vmem>>, %arg2: memref<1x64xf32, #tpu.memory_space<vmem>>, %arg3: memref<64x64xbf16, #tpu.memory_space<vmem>>, %arg4: memref<32x8xbf16, #tpu.memory_space<vmem>>, %arg5: memref<1x8xf32, #tpu.memory_space<vmem>>, %arg6: memref<8x8xf32, #tpu.memory_space<vmem>>) attributes {dimension_semantics = [], scalar_prefetch = 0 : i64, scratch_operands = 0 : i64, tpu.core_type = #tpu.core_type<tc>} {
    %c0 = arith.constant 0 : index
    %c0_0 = arith.constant 0 : index
    %0 = vector.load %arg0[%c0, %c0_0] : memref<64x16xf32, #tpu.memory_space<vmem>>, vector<64x16xf32>
    %1 = arith.truncf %0 : vector<64x16xf32> to vector<64x16xbf16>
    %c0_1 = arith.constant 0 : index
    %c0_2 = arith.constant 0 : index
    %2 = vector.load %arg1[%c0_1, %c0_2] : memref<16x64xbf16, #tpu.memory_space<vmem>>, vector<16x64xbf16>
    %cst = arith.constant dense<0.000000e+00> : vector<64x64xf32>
    %3 = tpu.matmul %1, %2, %cst {dimension_numbers = #tpu.dot_dimension_numbers<[1], [0], [0], [1], [0, 0, 1, 1], [], []>} : vector<64x16xbf16>, vector<16x64xbf16>, vector<64x64xf32> -> vector<64x64xf32>
    %c0_3 = arith.constant 0 : index
    %c0_4 = arith.constant 0 : index
    %4 = vector.load %arg2[%c0_3, %c0_4] : memref<1x64xf32, #tpu.memory_space<vmem>>, vector<1x64xf32>
    %5 = vector.broadcast %4 : vector<1x64xf32> to vector<64x64xf32>
    %6 = arith.addf %3, %5 : vector<64x64xf32>
    %c0_5 = arith.constant 0 : index
    %c0_6 = arith.constant 0 : index
    %7 = vector.load %arg3[%c0_5, %c0_6] : memref<64x64xbf16, #tpu.memory_space<vmem>>, vector<64x64xbf16>
    %8 = tpu.iota {dimensions = array<i32: 1>} : vector<8x64xi32>
    %cst_7 = arith.constant 0.000000e+00 : f32
    %9 = vector.broadcast %cst_7 : f32 to vector<8x64xf32>
    %10 = vector.extract_strided_slice %6 {offsets = [0, 0], sizes = [8, 64], strides = [1, 1]} : vector<64x64xf32> to vector<8x64xf32>
    %11 = arith.truncf %9 : vector<8x64xf32> to vector<8x64xbf16>
    %cst_8 = arith.constant dense<0.000000e+00> : vector<8x64xf32>
    %12 = tpu.matmul %11, %7, %cst_8 {dimension_numbers = #tpu.dot_dimension_numbers<[1], [0], [0], [1], [0, 0, 1, 1], [], []>} : vector<8x64xbf16>, vector<64x64xbf16>, vector<8x64xf32> -> vector<8x64xf32>
    %13 = arith.addf %10, %12 : vector<8x64xf32>
    %14 = math.tanh %13 : vector<8x64xf32>
    %c32_i32 = arith.constant 32 : i32
    %15 = vector.broadcast %c32_i32 : i32 to vector<8x64xi32>
    %16 = arith.cmpi slt, %8, %15 : vector<8x64xi32>
    %cst_9 = arith.constant 0.000000e+00 : f32
    %17 = vector.broadcast %cst_9 : f32 to vector<8x64xf32>
    %18 = arith.select %16, %14, %17 : vector<8x64xi1>, vector<8x64xf32>
    %19 = vector.extract_strided_slice %6 {offsets = [8, 0], sizes = [8, 64], strides = [1, 1]} : vector<64x64xf32> to vector<8x64xf32>
    %20 = arith.truncf %18 : vector<8x64xf32> to vector<8x64xbf16>
    %cst_10 = arith.constant dense<0.000000e+00> : vector<8x64xf32>
    %21 = tpu.matmul %20, %7, %cst_10 {dimension_numbers = #tpu.dot_dimension_numbers<[1], [0], [0], [1], [0, 0, 1, 1], [], []>} : vector<8x64xbf16>, vector<64x64xbf16>, vector<8x64xf32> -> vector<8x64xf32>
    %22 = arith.addf %19, %21 : vector<8x64xf32>
    %23 = math.tanh %22 : vector<8x64xf32>
    %24 = vector.extract_strided_slice %6 {offsets = [16, 0], sizes = [8, 64], strides = [1, 1]} : vector<64x64xf32> to vector<8x64xf32>
    %25 = arith.truncf %23 : vector<8x64xf32> to vector<8x64xbf16>
    %cst_11 = arith.constant dense<0.000000e+00> : vector<8x64xf32>
    %26 = tpu.matmul %25, %7, %cst_11 {dimension_numbers = #tpu.dot_dimension_numbers<[1], [0], [0], [1], [0, 0, 1, 1], [], []>} : vector<8x64xbf16>, vector<64x64xbf16>, vector<8x64xf32> -> vector<8x64xf32>
    %27 = arith.addf %24, %26 : vector<8x64xf32>
    %28 = math.tanh %27 : vector<8x64xf32>
    %29 = vector.extract_strided_slice %6 {offsets = [24, 0], sizes = [8, 64], strides = [1, 1]} : vector<64x64xf32> to vector<8x64xf32>
    %30 = arith.truncf %28 : vector<8x64xf32> to vector<8x64xbf16>
    %cst_12 = arith.constant dense<0.000000e+00> : vector<8x64xf32>
    %31 = tpu.matmul %30, %7, %cst_12 {dimension_numbers = #tpu.dot_dimension_numbers<[1], [0], [0], [1], [0, 0, 1, 1], [], []>} : vector<8x64xbf16>, vector<64x64xbf16>, vector<8x64xf32> -> vector<8x64xf32>
    %32 = arith.addf %29, %31 : vector<8x64xf32>
    %33 = math.tanh %32 : vector<8x64xf32>
    %34 = vector.extract_strided_slice %6 {offsets = [32, 0], sizes = [8, 64], strides = [1, 1]} : vector<64x64xf32> to vector<8x64xf32>
    %35 = arith.truncf %33 : vector<8x64xf32> to vector<8x64xbf16>
    %cst_13 = arith.constant dense<0.000000e+00> : vector<8x64xf32>
    %36 = tpu.matmul %35, %7, %cst_13 {dimension_numbers = #tpu.dot_dimension_numbers<[1], [0], [0], [1], [0, 0, 1, 1], [], []>} : vector<8x64xbf16>, vector<64x64xbf16>, vector<8x64xf32> -> vector<8x64xf32>
    %37 = arith.addf %34, %36 : vector<8x64xf32>
    %38 = math.tanh %37 : vector<8x64xf32>
    %39 = vector.extract_strided_slice %6 {offsets = [40, 0], sizes = [8, 64], strides = [1, 1]} : vector<64x64xf32> to vector<8x64xf32>
    %40 = arith.truncf %38 : vector<8x64xf32> to vector<8x64xbf16>
    %cst_14 = arith.constant dense<0.000000e+00> : vector<8x64xf32>
    %41 = tpu.matmul %40, %7, %cst_14 {dimension_numbers = #tpu.dot_dimension_numbers<[1], [0], [0], [1], [0, 0, 1, 1], [], []>} : vector<8x64xbf16>, vector<64x64xbf16>, vector<8x64xf32> -> vector<8x64xf32>
    %42 = arith.addf %39, %41 : vector<8x64xf32>
    %43 = math.tanh %42 : vector<8x64xf32>
    %44 = vector.extract_strided_slice %6 {offsets = [48, 0], sizes = [8, 64], strides = [1, 1]} : vector<64x64xf32> to vector<8x64xf32>
    %45 = arith.truncf %43 : vector<8x64xf32> to vector<8x64xbf16>
    %cst_15 = arith.constant dense<0.000000e+00> : vector<8x64xf32>
    %46 = tpu.matmul %45, %7, %cst_15 {dimension_numbers = #tpu.dot_dimension_numbers<[1], [0], [0], [1], [0, 0, 1, 1], [], []>} : vector<8x64xbf16>, vector<64x64xbf16>, vector<8x64xf32> -> vector<8x64xf32>
    %47 = arith.addf %44, %46 : vector<8x64xf32>
    %48 = math.tanh %47 : vector<8x64xf32>
    %49 = vector.extract_strided_slice %6 {offsets = [56, 0], sizes = [8, 64], strides = [1, 1]} : vector<64x64xf32> to vector<8x64xf32>
    %50 = arith.truncf %48 : vector<8x64xf32> to vector<8x64xbf16>
    %cst_16 = arith.constant dense<0.000000e+00> : vector<8x64xf32>
    %51 = tpu.matmul %50, %7, %cst_16 {dimension_numbers = #tpu.dot_dimension_numbers<[1], [0], [0], [1], [0, 0, 1, 1], [], []>} : vector<8x64xbf16>, vector<64x64xbf16>, vector<8x64xf32> -> vector<8x64xf32>
    %52 = arith.addf %49, %51 : vector<8x64xf32>
    %53 = math.tanh %52 : vector<8x64xf32>
    %54 = vector.extract_strided_slice %6 {offsets = [56, 0], sizes = [8, 64], strides = [1, 1]} : vector<64x64xf32> to vector<8x64xf32>
    %55 = arith.truncf %53 : vector<8x64xf32> to vector<8x64xbf16>
    %cst_17 = arith.constant dense<0.000000e+00> : vector<8x64xf32>
    %56 = tpu.matmul %55, %7, %cst_17 {dimension_numbers = #tpu.dot_dimension_numbers<[1], [0], [0], [1], [0, 0, 1, 1], [], []>} : vector<8x64xbf16>, vector<64x64xbf16>, vector<8x64xf32> -> vector<8x64xf32>
    %57 = arith.addf %54, %56 : vector<8x64xf32>
    %58 = math.tanh %57 : vector<8x64xf32>
    %59 = vector.extract_strided_slice %58 {offsets = [0, 32], sizes = [8, 32], strides = [1, 1]} : vector<8x64xf32> to vector<8x32xf32>
    %60 = arith.truncf %59 : vector<8x32xf32> to vector<8x32xbf16>
    %c0_18 = arith.constant 0 : index
    %c0_19 = arith.constant 0 : index
    %61 = vector.load %arg4[%c0_18, %c0_19] : memref<32x8xbf16, #tpu.memory_space<vmem>>, vector<32x8xbf16>
    %cst_20 = arith.constant dense<0.000000e+00> : vector<8x8xf32>
    %62 = tpu.matmul %60, %61, %cst_20 {dimension_numbers = #tpu.dot_dimension_numbers<[1], [0], [0], [1], [0, 0, 1, 1], [], []>} : vector<8x32xbf16>, vector<32x8xbf16>, vector<8x8xf32> -> vector<8x8xf32>
    %c0_21 = arith.constant 0 : index
    %c0_22 = arith.constant 0 : index
    %63 = vector.load %arg5[%c0_21, %c0_22] : memref<1x8xf32, #tpu.memory_space<vmem>>, vector<1x8xf32>
    %64 = vector.broadcast %63 : vector<1x8xf32> to vector<8x8xf32>
    %65 = arith.addf %62, %64 : vector<8x8xf32>
    %c0_23 = arith.constant 0 : index
    %c0_24 = arith.constant 0 : index
    %66 = vector.load %arg6[%c0_23, %c0_24] : memref<8x8xf32, #tpu.memory_space<vmem>>, vector<8x8xf32>
    tpu.vector_store %arg6[%c0_23, %c0_24], %65 {strides = array<i32>} : memref<8x8xf32, #tpu.memory_space<vmem>>, vector<8x8xf32>,
    return
  }
}

</mosaic_0001>

<bundles_post_ra>
// kernel: tpu_custom_call.1
= control target key start
LH: loop header
LB: loop body
LE: loop exit
PB: predicated region body
PF: predicated region fallthrough
CT: control target
= control target key end

     0   :  { %vm49_vm0 = vcmask 130048   ;;  %s590_s0 = inlined_call_operand.vmem [shape: f32[64,16], index: 0, kind: input, shape index: {}]   ;;  %s591_s1 = inlined_call_operand.vmem [shape: bf16[16,64], index: 1, kind: input, shape index: {}]   ;;  %s592_s2 = inlined_call_operand.vmem [shape: f32[1,64], index: 2, kind: input, shape index: {}]   ;;  %s593_s3 = inlined_call_operand.vmem [shape: bf16[64,64], index: 3, kind: input, shape index: {}]   ;;  %s594_s4 = inlined_call_operand.vmem [shape: bf16[32,8], index: 4, kind: input, shape index: {}]   ;;  %s595_s5 = inlined_call_operand.vmem [shape: f32[1,8], index: 5, kind: input, shape index: {}]   ;;  %s596_s6 = inlined_call_operand.hbm [shape: f32[8,8], index: 6, kind: output, shape index: {}]  }
   0x1   :  { %v495_v0 = vld [vmem:[%s593_s3 + $0x18] sm:$0xff]  ;;  %v398_v1 = vld [vmem:[%s591_s1] sm:$0xff]  ;;  %v26_v3 = vld [vmem:[%s590_s0 + $0x8] sm:$0xff] }
   0x2   :  { %v25_v2 = vld [vmem:[%s590_s0] sm:$0xff]  ;;  %133 = vmatpush.bf16.msra.mxu1 %v495_v0  ;;  %69 = vmatpush.bf16.msra.mxu0 %v398_v1  ;;  %v510_v4 = vld [vmem:[%s593_s3 + $0x10] sm:$0xff] }
   0x3   :  { %v33_v5 = vpack.c.bf16 %v26_v3, %v25_v2  ;;  %154 = vmatpush.bf16.msra.mxu2 %v495_v0  ;;  %173 = vmatpush.bf16.msra.mxu3 %v495_v0 }
   0x4   :  { %11 = vsyncpa [#allocation3], 0  ;;  %v400_v6 = vld [vmem:[%s593_s3 + $0x8] sm:$0xff]  ;;  %v399_v7 = vld [vmem:[%s593_s3] sm:$0xff]  ;;  %v454_v8 = vmov 0   ;;  %v99_v12 = vlaneseq  ;;  %vm125_vm2 = vcmask 523264  }
   0x5   :  { %361 = vmatmul.msk.bf16.vlgmr.msra.gmra.mxu0 %vm49_vm0, %v33_v5  ;;  %v535_v9 = vld [vmem:[%s592_s2] ss:$0 sm:$0xff]  ;;  %v27_v20 = vld [vmem:[%s590_s0 + $0x10] sm:$0xff]  ;;  %v28_v21 = vld [vmem:[%s590_s0 + $0x18] sm:$0xff]  ;;  %s455_s25 = smov 96   ;;  %vm322_vm3 = vcmask 261120  }
   0x6   :  { %134 = vmatpush.bf16.msra.mxu1 %v510_v4  ;;  %v100_v15 = vand.u32 127, %v99_v12  ;;  %v34_v22 = vpack.c.bf16 %v28_v21, %v27_v20  ;;  %v29_v37 = vld [vmem:[%s590_s0 + $0x20] sm:$0xff]  ;;  %v30_v38 = vld [vmem:[%s590_s0 + $0x28] sm:$0xff]  ;;  %v31_v54 = vld [vmem:[%s590_s0 + $0x30] sm:$0xff]  ;;  %s456_s28 = smov [#allocation2]   ;;  %s348_s1 = sshll.u32 %s596_s6, 4  ;;  %s349_s1 = int_to_ptr.hbm [resolvable:$true] %s348_s1 }
   0x7   :  { %155 = vmatpush.bf16.msra.mxu2 %v510_v4  ;;  %174 = vmatpush.bf16.msra.mxu3 %v510_v4  ;;  %v35_v39 = vpack.c.bf16 %v30_v38, %v29_v37  ;;  %v32_v55 = vld [vmem:[%s590_s0 + $0x38] sm:$0xff]  ;;  %s346_s29 = sshll.u32 %s456_s28, 4  ;;  %vm339_vm4 = vcmask 64512   ;;  %s347_s29 = int_to_ptr.vmem [resolvable:$true] %s346_s29 }
   0x8   :  { %vm144_vm1 = vcmp.lt.s32.totalorder %v100_v15, 32  ;;  %v36_v56 = vpack.c.bf16 %v32_v55, %v31_v54  ;;  %v404_v15 = vld [vmem:[%s594_s4 + $0x8] sm:$0xff] }
   0xa   :  { %135 = vmatpush.bf16.msra.mxu1 %v400_v6 }
   0xb   :  { %156 = vmatpush.bf16.msra.mxu2 %v400_v6  ;;  %175 = vmatpush.bf16.msra.mxu3 %v400_v6 }
   0xe   :  { %136 = vmatpush.bf16.msra.mxu1 %v399_v7 }
   0xf   :  { %157 = vmatpush.bf16.msra.mxu2 %v399_v7  ;;  %176 = vmatpush.bf16.msra.mxu3 %v399_v7 }
  0x11   :  { %137 = vmatmul.bf16.vlgmr.msra.gmra.mxu1 %v454_v8 }
  0x12   :  { %192 = vmatpush.bf16.msrb.mxu1 %v495_v0 }
  0x13   :  { %211 = vmatpush.bf16.msrb.mxu2 %v495_v0  ;;  %230 = vmatpush.bf16.msrb.mxu3 %v495_v0 }
  0x15   :  { %362 = vmatmul.msk.bf16.gmra.mxu0 %vm49_vm0, %v34_v22  ;;  %v409_v22 = vld [vmem:[%s595_s5] ss:$0 sm:$0xff] }
  0x16   :  { %193 = vmatpush.bf16.msrb.mxu1 %v510_v4 }
  0x17   :  { %212 = vmatpush.bf16.msrb.mxu2 %v510_v4  ;;  %231 = vmatpush.bf16.msrb.mxu3 %v510_v4 }
  0x1a   :  { %194 = vmatpush.bf16.msrb.mxu1 %v400_v6 }
  0x1b   :  { %213 = vmatpush.bf16.msrb.mxu2 %v400_v6  ;;  %232 = vmatpush.bf16.msrb.mxu3 %v400_v6 }
  0x1e   :  { %195 = vmatpush.bf16.msrb.mxu1 %v399_v7 }
  0x1f   :  { %214 = vmatpush.bf16.msrb.mxu2 %v399_v7  ;;  %233 = vmatpush.bf16.msrb.mxu3 %v399_v7 }
  0x22   :  { %249 = vmatpush.bf16.msra.mxu1 %v495_v0 }
  0x25   :  { %363 = vmatmul.msk.bf16.gmra.mxu0 %vm49_vm0, %v35_v39 }
  0x26   :  { %250 = vmatpush.bf16.msra.mxu1 %v510_v4 }
  0x2a   :  { %251 = vmatpush.bf16.msra.mxu1 %v400_v6 }
  0x2e   :  { %252 = vmatpush.bf16.msra.mxu1 %v399_v7 }
  0x35   :  { %364 = vmatmul.msk.bf16.gmra.mxu0 %vm49_vm0, %v36_v56 }
  0x82   :  { %v71_v10 = vpop.f32.mrf.mxu0 }
  0x83   :  { %v72_v11 = vadd.f32 %v535_v9, %v71_v10 }
  0x8a   :  { %v73_v23 = vpop.f32.mrf.mxu0 }
  0x8b   :  { %v74_v24 = vadd.f32 %v535_v9, %v73_v23 }
  0x8e   :  { %v138_v13 = vpop.f32.mrf.mxu1 }
  0x8f   :  { %v142_v14 = vadd.f32 %v138_v13, %v72_v11 }
  0x91   :  { %410 = vtanh.f32 %v142_v14 }
  0x92   :  { %v76_v30 = vpop.f32.mrf.mxu0 }
  0x93   :  { %v77_v31 = vadd.f32 %v535_v9, %v76_v30 }
  0x96   :  { %v140_v16 = vpop.f32.mrf.mxu1 }
  0x97   :  { %v411_v17 = vpop.eup %410  ;;  %v403_v16 = vld [vmem:[%s594_s4] sm:$0xff] }
  0x98   :  { %v145_v18 = vsel %vm144_vm1, %v411_v17, 0.0 }
  0x99   :  { %v146_v19 = vpack.c.bf16 %v145_v18, %v145_v18 }
  0x9a   :  { %v78_v40 = vpop.f32.mrf.mxu0 }
  0x9b   :  { %381 = vmatmul.msk.bf16.vlgmr.msra.gmra.mxu2 %vm125_vm2, %v146_v19  ;;  %v79_v41 = vadd.f32 %v535_v9, %v78_v40 }
  0x9c   :  { %268 = vmatpush.bf16.msra.mxu2 %v495_v0 }
  0xa0   :  { %269 = vmatpush.bf16.msra.mxu2 %v510_v4 }
  0xa2   :  { %v81_v47 = vpop.f32.mrf.mxu0 }
  0xa3   :  { %v82_v48 = vadd.f32 %v535_v9, %v81_v47 }
  0xa4   :  { %270 = vmatpush.bf16.msra.mxu2 %v400_v6 }
  0xa8   :  { %271 = vmatpush.bf16.msra.mxu2 %v399_v7 }
  0xaa   :  { %v83_v57 = vpop.f32.mrf.mxu0 }
  0xab   :  { %v84_v58 = vadd.f32 %v535_v9, %v83_v57 }
 0x11e   :  { %v159_v25 = vpop.f32.mrf.mxu2 }
 0x11f   :  { %v163_v26 = vadd.f32 %v159_v25, %v74_v24 }
 0x121   :  { %412 = vtanh.f32 %v163_v26 }
 0x126   :  { %v161_v27 = vpop.f32.mrf.mxu2 }
 0x127   :  { %v413_v28 = vpop.eup %412 }
 0x128   :  { %v165_v29 = vpack.c.bf16 %v413_v28, %v413_v28 }
 0x12a   :  { %382 = vmatmul.msk.bf16.vlgmr.msra.gmra.mxu3 %vm125_vm2, %v165_v29 }
 0x12b   :  { %287 = vmatpush.bf16.msra.mxu3 %v495_v0  ;;  %v86_v0 = vpop.f32.mrf.mxu0 }
 0x12c   :  { %v87_v1 = vadd.f32 %v535_v9, %v86_v0 }
 0x12f   :  { %288 = vmatpush.bf16.msra.mxu3 %v510_v4 }
 0x133   :  { %289 = vmatpush.bf16.msra.mxu3 %v400_v6 }
 0x137   :  { %290 = vmatpush.bf16.msra.mxu3 %v399_v7  ;;  %v88_v7 = vpop.f32.mrf.mxu0 }
 0x138   :  { %v89_v8 = vadd.f32 %v535_v9, %v88_v7 }
 0x1ad   :  { %v178_v32 = vpop.f32.mrf.mxu3 }
 0x1ae   :  { %v182_v33 = vadd.f32 %v178_v32, %v77_v31 }
 0x1b0   :  { %414 = vtanh.f32 %v182_v33 }
 0x1b5   :  { %v180_v34 = vpop.f32.mrf.mxu3 }
 0x1b6   :  { %v415_v35 = vpop.eup %414 }
 0x1b7   :  { %v184_v36 = vpack.c.bf16 %v415_v35, %v415_v35 }
 0x1b9   :  { %383 = vmatmul.msk.bf16.vlgmr.msrb.gmra.mxu1 %vm125_vm2, %v184_v36 }
 0x1ba   :  { %332 = vmatpush.bf16.msrb.mxu1 %v404_v15 }
 0x1be   :  { %333 = vmatpush.bf16.msrb.mxu1 %v403_v16 }
 0x236   :  { %v197_v42 = vpop.f32.mrf.mxu1 }
 0x237   :  { %v201_v43 = vadd.f32 %v197_v42, %v79_v41 }
 0x239   :  { %416 = vtanh.f32 %v201_v43 }
 0x23e   :  { %v199_v44 = vpop.f32.mrf.mxu1 }
 0x23f   :  { %v417_v45 = vpop.eup %416 }
 0x240   :  { %v203_v46 = vpack.c.bf16 %v417_v45, %v417_v45 }
 0x242   :  { %384 = vmatmul.msk.bf16.vlgmr.msrb.gmra.mxu2 %vm125_vm2, %v203_v46 }
 0x2c5   :  { %v216_v49 = vpop.f32.mrf.mxu2 }
 0x2c6   :  { %v220_v50 = vadd.f32 %v216_v49, %v82_v48 }
 0x2c8   :  { %418 = vtanh.f32 %v220_v50 }
 0x2cd   :  { %v218_v51 = vpop.f32.mrf.mxu2 }
 0x2ce   :  { %v419_v52 = vpop.eup %418 }
 0x2cf   :  { %v222_v53 = vpack.c.bf16 %v419_v52, %v419_v52 }
 0x2d1   :  { %385 = vmatmul.msk.bf16.vlgmr.msrb.gmra.mxu3 %vm125_vm2, %v222_v53 }
 0x354   :  { %v235_v59 = vpop.f32.mrf.mxu3 }
 0x355   :  { %v239_v60 = vadd.f32 %v235_v59, %v84_v58 }
 0x357   :  { %420 = vtanh.f32 %v239_v60 }
 0x35c   :  { %v237_v61 = vpop.f32.mrf.mxu3 }
 0x35d   :  { %v421_v62 = vpop.eup %420 }
 0x35e   :  { %v241_v63 = vpack.c.bf16 %v421_v62, %v421_v62 }
 0x360   :  { %386 = vmatmul.msk.bf16.vlgmr.msra.gmra.mxu1 %vm125_vm2, %v241_v63 }
 0x3dd   :  { %v254_v2 = vpop.f32.mrf.mxu1 }
 0x3de   :  { %v258_v3 = vadd.f32 %v254_v2, %v87_v1 }
 0x3e0   :  { %422 = vtanh.f32 %v258_v3 }
 0x3e5   :  { %v256_v4 = vpop.f32.mrf.mxu1 }
 0x3e6   :  { %v423_v5 = vpop.eup %422 }
 0x3e7   :  { %v260_v6 = vpack.c.bf16 %v423_v5, %v423_v5 }
 0x3e9   :  { %387 = vmatmul.msk.bf16.vlgmr.msra.gmra.mxu2 %vm125_vm2, %v260_v6 }
 0x46c   :  { %v273_v10 = vpop.f32.mrf.mxu2 }
 0x46d   :  { %v277_v11 = vadd.f32 %v273_v10, %v89_v8 }
 0x46f   :  { %424 = vtanh.f32 %v277_v11 }
 0x474   :  { %v275_v12 = vpop.f32.mrf.mxu2 }
 0x475   :  { %v425_v13 = vpop.eup %424 }
 0x476   :  { %v279_v14 = vpack.c.bf16 %v425_v13, %v425_v13 }
 0x478   :  { %388 = vmatmul.msk.bf16.vlgmr.msra.gmra.mxu3 %vm125_vm2, %v279_v14 }
 0x4fb   :  { %v292_v17 = vpop.f32.mrf.mxu3 }
 0x4fc   :  { %v296_v9 = vadd.f32 %v292_v17, %v89_v8 }
 0x4fe   :  { %426 = vtanh.f32 %v296_v9 }
 0x503   :  { %v294_v18 = vpop.f32.mrf.mxu3 }
 0x504   :  { %v427_v19 = vpop.eup %426 }
 0x505   :  { %v298_v20 = vpack.c.bf16 %v427_v19, %v427_v19 }
 0x507   :  { %308 = vrot.lane.b32.xlu0 %v298_v20, %s455_s25 }
 0x579   :  { %v309_v21 = vpop.permute.xlu0 %308 }
 0x57a   :  { %397 = vmatmul.msk.bf16.vlgmr.msrb.gmra.mxu1 %vm322_vm3, %v309_v21 }
 0x5f7   :  { %v335_v23 = vpop.f32.mrf.mxu1 }
 0x5f8   :  { %v336_v24 = vadd.f32 %v409_v22, %v335_v23 }
 0x5fa   :  { %340 = vst.msk [vmem:[#allocation2] sm:$0xff] %vm339_vm4, %v336_v24 }
 0x5fb   :  { %351 = dma.vmem_to_hbm [thread:$0]  %s347_s29, 128, %s349_s1, [#allocation3]  }
 0x5ff   :  { %v337_v25 = vpop.f32.mrf.mxu1 }
 0x600   :  { %452 = dma.done.wait [#allocation3], 128  }
 0x601   :  { %453 = vsyncadd [#allocation3], 4294967168 }
 0x602   :  { %356 = vsyncpa [#allocation3], 1 }

</bundles_post_ra>
